<compile_context>
chip_gen: v7x
topology: tpu7x:2x2x1
jax: 0.10.0
libtpu: 0.0.40
codegen_flags: <defaults>
</compile_context>

<pallas_src>
import functools

import jax
import jax.numpy as jnp
from jax.experimental import pallas as pl
from jax.experimental.pallas import tpu as pltpu

LANE = 128


def _silu_kernel(x_ref, o_ref):
    x = x_ref[...]
    # f32 compute is a no-op for f32 inputs and strictly more accurate for
    # bf16; it is free filler in a mem-bound kernel.
    xf = x.astype(jnp.float32)
    o_ref[...] = (xf * jax.nn.sigmoid(xf)).astype(o_ref.dtype)


def _cdiv(a: int, b: int) -> int:
    return -(-a // b)


def _round_up(a: int, b: int) -> int:
    return _cdiv(a, b) * b


@functools.partial(jax.jit, static_argnames=("target_block_bytes", "min_grid_steps"))
def silu(x: jax.Array, *, target_block_bytes: int = 4 * 1024 * 1024,
         min_grid_steps: int = 4) -> jax.Array:
    """Elementwise SiLU via a Pallas TPU kernel (floating-point dtypes)."""
    orig_shape = x.shape
    orig_dtype = x.dtype
    n = x.size
    if n == 0:
        return x

    itemsize = jnp.dtype(orig_dtype).itemsize
    # Native sublane tile: sub-32-bit dtypes pack 2/4 rows per sublane, so keep
    # block_rows a multiple of 8 (f32) / 16 (bf16,f16) / 32 (int8,fp8).
    sublane = 8 * max(1, 4 // itemsize)

    x_flat = x.reshape(-1)                     # free: contiguous reshape
    n_lane = _round_up(n, LANE)
    if n_lane != n:
        # TODO(synk): this <128-element tail pad and the matching final slice
        # are whole-array HBM passes; a masked-tail kernel over the raw 1-D
        # buffer (manual DMA) would avoid them.  Aligned sizes (the usual
        # conv-activation case, including the tests below) take the zero-copy
        # path and never hit this branch.
        x_flat = jnp.pad(x_flat, (0, n_lane - n))
    rows = n_lane // LANE
    x2d = x_flat.reshape(rows, LANE)

    # --- block sizing ------------------------------------------------------
    # ~target_block_bytes per block (amortizes the ~0.35 us per-grid-step
    # overhead), rounded to the sublane tile, capped so tensors >= 2 MiB get at
    # least `min_grid_steps` grid steps (lets megacore / v7x split the stream
    # across both TensorCores), and never larger than the (rounded) array.
    block_rows = max(sublane, target_block_bytes // (LANE * itemsize))
    block_rows = _round_up(block_rows, sublane)
    total_bytes = rows * LANE * itemsize
    if total_bytes >= 2 * 1024 * 1024 and min_grid_steps > 1:
        block_rows = min(block_rows,
                         _round_up(_cdiv(rows, min_grid_steps), sublane))
    block_rows = min(block_rows, _round_up(rows, sublane))

    grid = (_cdiv(rows, block_rows),)          # partial last block is masked

    # Scoped VMEM: double-buffered input + output plus slack.  Explicit so the
    # v5e 16 MiB default doesn't bind; capped at 48 MiB to stay inside v7x's
    # 64 MiB physical VMEM.
    block_bytes = block_rows * LANE * itemsize
    vmem_limit = min(max(4 * block_bytes + (4 << 20), 32 << 20), 48 << 20)

    cost = pl.CostEstimate(
        flops=5 * n,              # mul + sigmoid arithmetic (rough)
        transcendentals=n,        # one exp per element
        bytes_accessed=2 * n * itemsize,
    )

    out2d = pl.pallas_call(
        _silu_kernel,
        out_shape=jax.ShapeDtypeStruct((rows, LANE), orig_dtype),
        grid_spec=pltpu.PrefetchScalarGridSpec(
            num_scalar_prefetch=0,
            grid=grid,
            in_specs=[pl.BlockSpec((block_rows, LANE), lambda i: (i, 0))],
            out_specs=pl.BlockSpec((block_rows, LANE), lambda i: (i, 0)),
        ),
        compiler_params=pltpu.CompilerParams(
            dimension_semantics=("parallel",),
            vmem_limit_bytes=vmem_limit,
        ),
        cost_estimate=cost,
    )(x2d)

    out_flat = out2d.reshape(-1)
    if n_lane != n:
        out_flat = out_flat[:n]
    return out_flat.reshape(orig_shape)


if __name__ == "__main__":
    def ref_silu(v):
        return v * jax.nn.sigmoid(v)

    # NCHW activation consistent with PyTorch conv-net usage (128-aligned ->
    # zero-copy path).
    x = jax.random.normal(jax.random.PRNGKey(0), (2, 4, 16, 16), dtype=jnp.float32)
    y = jax.block_until_ready(silu(x))
    assert y.shape == x.shape and y.dtype == x.dtype
    assert jnp.allclose(y, ref_silu(x), atol=1e-6, rtol=1e-6)

    # Non-128-aligned size: exercises the tail-pad + cdiv-grid path.
    x2 = jax.random.normal(jax.random.PRNGKey(1), (3, 5, 7, 11), dtype=jnp.float32)
    y2 = jax.block_until_ready(silu(x2))
    assert y2.shape == x2.shape and y2.dtype == x2.dtype
    assert jnp.allclose(y2, ref_silu(x2), atol=1e-6, rtol=1e-6)

    # Tiny input (rows < sublane tile): single partial block, Pallas edge
    # masking (robustness case flagged in review).
    x3 = jax.random.normal(jax.random.PRNGKey(2), (5,), dtype=jnp.float32)
    y3 = jax.block_until_ready(silu(x3))
    assert y3.shape == x3.shape and y3.dtype == x3.dtype
    assert jnp.allclose(y3, ref_silu(x3), atol=1e-6, rtol=1e-6)

    # bf16: exercises the 16-row sublane tile and f32 compute upcast.
    x4 = jax.random.normal(jax.random.PRNGKey(3), (2, 4, 16, 16), dtype=jnp.bfloat16)
    y4 = jax.block_until_ready(silu(x4))
    assert y4.shape == x4.shape and y4.dtype == jnp.bfloat16
    assert jnp.allclose(y4.astype(jnp.float32),
                        ref_silu(x4.astype(jnp.float32)), atol=2e-2, rtol=2e-2)

    print("KERNEL_OK")
</pallas_src>

<mosaic_0001>
module attributes {stable_mosaic.version = 11 : i64} {
  func.func @_silu_kernel(%arg0: i32, %arg1: memref<16x128xf32, #tpu.memory_space<vmem>>, %arg2: memref<16x128xf32, #tpu.memory_space<vmem>>) attributes {dimension_semantics = [#tpu.dimension_semantics<parallel>], iteration_bounds = array<i64: 1>, scalar_prefetch = 0 : i64, scratch_operands = 0 : i64, tpu.core_type = #tpu.core_type<tc>, window_params = [{transform_indices = @transform_0, window_bounds = array<i64: 16, 128>}, {transform_indices = @transform_1, window_bounds = array<i64: 16, 128>}]} {
    %c0 = arith.constant 0 : index
    %c0_0 = arith.constant 0 : index
    %0 = vector.load %arg1[%c0, %c0_0] : memref<16x128xf32, #tpu.memory_space<vmem>>, vector<16x128xf32>
    %1 = arith.negf %0 : vector<16x128xf32>
    %2 = math.exp %1 : vector<16x128xf32>
    %cst = arith.constant 1.000000e+00 : f32
    %3 = vector.broadcast %cst : f32 to vector<16x128xf32>
    %4 = arith.addf %3, %2 : vector<16x128xf32>
    %5 = arith.divf %3, %4 : vector<16x128xf32>
    %6 = arith.mulf %0, %5 : vector<16x128xf32>
    %c0_1 = arith.constant 0 : index
    %c0_2 = arith.constant 0 : index
    %7 = vector.load %arg2[%c0_1, %c0_2] : memref<16x128xf32, #tpu.memory_space<vmem>>, vector<16x128xf32>
    tpu.vector_store %arg2[%c0_1, %c0_2], %6 {strides = array<i32>} : memref<16x128xf32, #tpu.memory_space<vmem>>, vector<16x128xf32>,
    return
  }
  func.func @transform_0(%arg0: i32) -> (i32, i32) {
    %c0_i32 = arith.constant 0 : i32
    %c0_i32_0 = arith.constant 0 : i32
    return %arg0, %c0_i32 : i32, i32
  }
  func.func @transform_1(%arg0: i32) -> (i32, i32) {
    %c0_i32 = arith.constant 0 : i32
    %c0_i32_0 = arith.constant 0 : i32
    return %arg0, %c0_i32 : i32, i32
  }
}

</mosaic_0001>

<bundles_post_ra>
// kernel: silu.1
= control target key start
LH: loop header
LB: loop body
LE: loop exit
PB: predicated region body
PF: predicated region fallthrough
CT: control target
= control target key end

     0   :  { %s62_s0 = inlined_call_operand.vmem [shape: f32[16,128], index: 0, kind: input, shape index: {}]   ;;  %s63_s1 = inlined_call_operand.vmem [shape: f32[16,128], index: 1, kind: output, shape index: {}]  }
   0x1   :  { %v8_v0 = vld [vmem:[%s62_s0] sm:$0xff]  ;;  %v9_v1 = vld [vmem:[%s62_s0 + $0x8] sm:$0xff] }
   0x2   :  { %v30_v2 = vmul.f32 -1.442695, %v8_v0  ;;  %v31_v3 = vmul.f32 -1.442695, %v9_v1 }
   0x4   :  { %32 = vpow2.f32 %v30_v2 }
   0x5   :  { %34 = vpow2.f32 %v31_v3 }
   0xe   :  { %v33_v4 = vpop.eup %32 }
   0xf   :  { %v35_v5 = vpop.eup %34  ;;  %v16_v6 = vadd.f32 1.0, %v33_v4 }
  0x10   :  { %v17_v7 = vadd.f32 1.0, %v35_v5 }
  0x11   :  { %36 = vrcp.f32 %v16_v6 }
  0x12   :  { %38 = vrcp.f32 %v17_v7 }
  0x1b   :  { %v37_v8 = vpop.eup %36 }
  0x1c   :  { %v39_v9 = vpop.eup %38  ;;  %v22_v10 = vmul.f32 %v37_v8, %v8_v0 }
  0x1d   :  { %v23_v11 = vmul.f32 %v39_v9, %v9_v1 }
  0x1e   :  { %24 = vst [vmem:[%s63_s1] sm:$0xff] %v22_v10 }
  0x1f   :  { %25 = vst [vmem:[%s63_s1 + $0x8] sm:$0xff] %v23_v11 }

</bundles_post_ra>
